<compile_context>
chip_gen: v6e
topology: v6e:2x2x1
jax: 0.10.0
libtpu: 0.0.40
codegen_flags: <defaults>
</compile_context>

<pallas_src>
import jax
import jax.numpy as jnp
from jax import lax
from jax.experimental import pallas as pl
from jax.experimental.pallas import tpu as pltpu


def _leaky_relu(x):
    return jnp.maximum(x, 0.1 * x)


# ---------------------------------------------------------------------------
# Single-step forward kernel (module.forward)
# ---------------------------------------------------------------------------
def performance_rnn_fwd_kernel(event_ref, fused_w_ref, in_b_ref, w_xhT_ref,
                               out_wT_ref, out_b_ref, h0_ref, c0_ref,
                               packed_ref):
    B = event_ref.shape[0]
    V = fused_w_ref.shape[0]
    H = h0_ref.shape[1]

    # embedding folded into in_layer: x = LeakyReLU(onehot @ fused_w + b)
    ids = event_ref[...]                                          # (B, 1) int32
    col = lax.broadcasted_iota(jnp.int32, (B, V), 1)
    onehot = (ids == col).astype(jnp.float32).astype(jnp.bfloat16)
    x = jnp.dot(onehot, fused_w_ref[...],
                preferred_element_type=jnp.float32) + in_b_ref[...]   # (B, H)
    x = _leaky_relu(x)

    # fused LSTM gate matmul on a register-level [x | h0] concat (no scratch)
    xh = jnp.concatenate([x, h0_ref[...]], axis=1).astype(jnp.bfloat16)
    gates = jnp.dot(xh, w_xhT_ref[...],
                    preferred_element_type=jnp.float32)           # (B, 4H)

    # single EUP pass: tanh(z) = 2*sigmoid(2z) - 1 (g columns pre-scaled by 2)
    sig = jax.nn.sigmoid(gates)
    i_g = sig[:, 0:H]
    f_g = sig[:, H:2 * H]
    g_g = 2.0 * sig[:, 2 * H:3 * H] - 1.0
    o_g = sig[:, 3 * H:4 * H]
    c1 = f_g * c0_ref[...] + i_g * g_g
    h1 = o_g * jnp.tanh(c1)

    # out_layer (raw logits; Softmax only used in sampling)
    logits = jnp.dot(h1.astype(jnp.bfloat16), out_wT_ref[...],
                     preferred_element_type=jnp.float32) + out_b_ref[...]  # (B, V)

    # one unmasked lane-dense store: [logits | h1 | c1] = (B, V+2H)
    packed_ref[...] = jnp.concatenate([logits, h1, c1], axis=1)


def performance_rnn_forward(event, kparams, hidden):
    """event: (1, B) int; hidden: (h0, c0) each (1, B, H).
    Returns (logits (1,B,V), (h1 (1,B,H), c1 (1,B,H)))."""
    B = event.shape[1]
    h0 = hidden[0][0]                       # (B, H)
    c0 = hidden[1][0]                       # (B, H)
    V, H = kparams['fused_w'].shape
    ev = event.reshape(B, 1).astype(jnp.int32)

    vmem = pl.BlockSpec(memory_space=pltpu.MemorySpace.VMEM)
    ce = pl.CostEstimate(
        flops=2 * B * (V * H + (2 * H) * (4 * H) + H * V),
        transcendentals=B * 6 * H,
        bytes_accessed=2 * (V * H + 2 * H * 4 * H + H * V)
                       + 4 * (B + H + V + 2 * B * H + B * (V + 2 * H)))

    packed = pl.pallas_call(
        performance_rnn_fwd_kernel,
        out_shape=jax.ShapeDtypeStruct((B, V + 2 * H), jnp.float32),
        in_specs=[vmem] * 8,
        out_specs=vmem,
        cost_estimate=ce,
    )(ev, kparams['fused_w'], kparams['in_b'], kparams['w_xhT'],
      kparams['out_wT'], kparams['out_b'], h0, c0)

    logits = packed[:, :V]
    h1 = packed[:, V:V + H]
    c1 = packed[:, V + H:]
    return logits[None], (h1[None], c1[None])


# ---------------------------------------------------------------------------
# Fused autoregressive greedy generate kernel (module.generate, greedy=True)
# grid=(batch_groups,) [parallel]; the steps loop is a lax.fori_loop inside.
# Weights stay VMEM-resident (constant index_maps); state lives in the carry.
# ---------------------------------------------------------------------------
def performance_rnn_gen_kernel(fused_w_ref, in_b_ref, w_xhT_ref, out_wT_ref,
                               out_b_ref, h0_ref, c0_ref,
                               logits_ref, events_ref):
    Bg, H = h0_ref.shape
    V = fused_w_ref.shape[0]
    Vp = out_b_ref.shape[1]
    steps = logits_ref.shape[0]

    # loop-invariant iotas, hoisted out of the step loop
    col_v = lax.broadcasted_iota(jnp.int32, (Bg, V), 1)
    col_p = lax.broadcasted_iota(jnp.int32, (Bg, Vp), 1).astype(jnp.float32)

    onehot0 = (col_v == (V - 1)).astype(jnp.float32).astype(jnp.bfloat16)

    def step_fn(t, carry):
        onehot, h, c = carry

        # embedding + in_layer folded
        x = jnp.dot(onehot, fused_w_ref[...],
                    preferred_element_type=jnp.float32) + in_b_ref[...]
        x = _leaky_relu(x)

        # fused gate matmul on a register-level [x | h] concat
        xh = jnp.concatenate([x, h], axis=1).astype(jnp.bfloat16)
        gates = jnp.dot(xh, w_xhT_ref[...],
                        preferred_element_type=jnp.float32)        # (Bg, 4H)
        sig = jax.nn.sigmoid(gates)                                 # 1 EUP pass
        i_g = sig[:, 0:H]
        f_g = sig[:, H:2 * H]
        g_g = 2.0 * sig[:, 2 * H:3 * H] - 1.0                       # tanh via sigmoid
        o_g = sig[:, 3 * H:4 * H]
        c1 = f_g * c + i_g * g_g
        h1 = o_g * jnp.tanh(c1)

        # out_layer; pad lanes already carry -1e30 via the baked bias
        logits = jnp.dot(h1.astype(jnp.bfloat16), out_wT_ref[...],
                         preferred_element_type=jnp.float32) + out_b_ref[...]
        logits_ref[pl.ds(t, 1)] = logits[None]                      # (1,Bg,Vp)

        # greedy sampling: first argmax -> event index + next one-hot
        row_max = jnp.max(logits, axis=1, keepdims=True)
        cand = jnp.where(logits >= row_max, col_p, jnp.float32(Vp))
        best_f = jnp.min(cand, axis=1, keepdims=True)               # (Bg, 1)
        best_i = best_f.astype(jnp.int32)
        events_ref[pl.ds(t, 1)] = best_i[None]                      # (1,Bg,1)

        onehot_next = (col_v == best_i).astype(jnp.float32).astype(jnp.bfloat16)
        return onehot_next, h1, c1

    carry0 = (onehot0, h0_ref[...], c0_ref[...])
    lax.fori_loop(0, steps, step_fn, carry0, unroll=steps <= 32)


def performance_rnn_generate(kparams, h0, c0, steps, batch_groups=1):
    """Greedy autoregressive generation fused into one pallas_call.
    Returns (events (steps, B) int32, logits (steps, B, V))."""
    B, H = h0.shape
    V = kparams['fused_w'].shape[0]
    Vp = kparams['out_wT_pad'].shape[1]
    G = batch_groups
    assert B % G == 0
    Bg = B // G
    assert Bg % 8 == 0, "per-group batch must be a multiple of 8 sublanes"

    grid_spec = pltpu.PrefetchScalarGridSpec(
        num_scalar_prefetch=0,
        grid=(G,),
        in_specs=[
            pl.BlockSpec((V, H), lambda g: (0, 0)),           # fused_w (resident)
            pl.BlockSpec((1, H), lambda g: (0, 0)),           # in_b
            pl.BlockSpec((2 * H, 4 * H), lambda g: (0, 0)),   # w_xhT (g cols x2)
            pl.BlockSpec((H, Vp), lambda g: (0, 0)),          # out_wT_pad
            pl.BlockSpec((1, Vp), lambda g: (0, 0)),          # out_b_pad (-1e30 pads)
            pl.BlockSpec((Bg, H), lambda g: (g, 0)),          # h0 per group
            pl.BlockSpec((Bg, H), lambda g: (g, 0)),          # c0 per group
        ],
        out_specs=(
            pl.BlockSpec((steps, Bg, Vp), lambda g: (0, g, 0)),   # logits
            pl.BlockSpec((steps, Bg, 1), lambda g: (0, g, 0)),    # events
        ),
    )

    flops_step = 2 * B * (V * H + (2 * H) * (4 * H) + H * Vp)
    ce = pl.CostEstimate(
        flops=steps * flops_step,
        transcendentals=steps * B * 6 * H,
        bytes_accessed=2 * (V * H + 2 * H * 4 * H + H * Vp)
                       + 4 * (H + Vp + 2 * B * H)
                       + 4 * steps * B * (Vp + 1))

    logits_pad, events3 = pl.pallas_call(
        performance_rnn_gen_kernel,
        out_shape=(jax.ShapeDtypeStruct((steps, B, Vp), jnp.float32),
                   jax.ShapeDtypeStruct((steps, B, 1), jnp.int32)),
        grid_spec=grid_spec,
        compiler_params=pltpu.CompilerParams(
            dimension_semantics=("parallel",),        # 2nd TC on v7x gets a group
            vmem_limit_bytes=32 * 1024 * 1024),       # headroom at real sizes (v5e)
        cost_estimate=ce,
    )(kparams['fused_w'], kparams['in_b'], kparams['w_xhT'],
      kparams['out_wT_pad'], kparams['out_b_pad'], h0, c0)

    logits = logits_pad[:, :, :V]
    events = events3[:, :, 0]
    return events, logits


# ---------------------------------------------------------------------------
# Parameter construction (matches the module's shapes / init style)
# ---------------------------------------------------------------------------
def init_params(key, in_dim, hidden_dim, out_dim, init_dim):
    ks = jax.random.split(key, 9)

    def xavier(k, shape):                               # torch (out_features, in_features)
        fan_out, fan_in = shape
        std = (2.0 / (fan_in + fan_out)) ** 0.5
        return std * jax.random.normal(k, shape, jnp.float32)

    emb_w = xavier(ks[0], (out_dim, out_dim))           # nn.Embedding(out_dim, out_dim)
    in_w = xavier(ks[1], (hidden_dim, in_dim))          # nn.Linear(in_dim, hidden)
    in_b = jax.random.uniform(ks[2], (1, hidden_dim), jnp.float32, -1, 1) / (in_dim ** 0.5)
    out_w = xavier(ks[3], (out_dim, hidden_dim))        # nn.Linear(hidden, out_dim)
    out_b = jax.random.uniform(ks[4], (1, out_dim), jnp.float32, -1, 1) / (hidden_dim ** 0.5)
    k_lstm = 1.0 / (hidden_dim ** 0.5)                  # nn.LSTM default uniform init
    w_ih = jax.random.uniform(ks[5], (4 * hidden_dim, hidden_dim), jnp.float32, -k_lstm, k_lstm)
    w_hh = jax.random.uniform(ks[6], (4 * hidden_dim, hidden_dim), jnp.float32, -k_lstm, k_lstm)
    init_w = xavier(ks[7], (hidden_dim, init_dim))      # nn.Linear(init_dim, L*dirs*hidden)
    init_b = jax.random.uniform(ks[8], (1, hidden_dim), jnp.float32, -1, 1) / (init_dim ** 0.5)

    return dict(emb_w=emb_w, in_wT=in_w.T, in_b=in_b,
                w_ihT=w_ih.T, w_hhT=w_hh.T,
                out_wT=out_w.T, out_b=out_b,
                init_wT=init_w.T, init_b=init_b)


def prepare_kernel_params(params, lane=128):
    """Host-side folding / packing:
       * fused_w = emb_w @ in_w.T         (embedding + in_layer in one matmul)
       * w_xhT   = [w_ih.T ; w_hh.T] with g-gate columns pre-scaled by 2
                   (tanh(z) = 2*sigmoid(2z) - 1; x2 is exact in bf16)
       * out_wT padded to 128 lanes, pad bias lanes = -1e30
       * matmul operands stored in bf16 (f32 accumulation in the kernels)."""
    fused_w = jnp.dot(params['emb_w'], params['in_wT'])                  # (V, H)
    H = params['in_wT'].shape[1]
    w_xhT = jnp.concatenate([params['w_ihT'], params['w_hhT']], axis=0)  # (2H, 4H)
    col_scale = jnp.concatenate([jnp.ones((1, 2 * H), jnp.float32),
                                 jnp.full((1, H), 2.0, jnp.float32),
                                 jnp.ones((1, H), jnp.float32)], axis=1)
    w_xhT_scaled = w_xhT * col_scale

    Hw, V = params['out_wT'].shape
    Vp = ((V + lane - 1) // lane) * lane
    out_wT_pad = jnp.zeros((Hw, Vp), jnp.float32).at[:, :V].set(params['out_wT'])
    out_b_pad = jnp.full((1, Vp), -1e30, jnp.float32).at[:, :V].set(params['out_b'])

    return dict(fused_w=fused_w.astype(jnp.bfloat16),
                in_b=params['in_b'],
                w_xhT=w_xhT_scaled.astype(jnp.bfloat16),
                out_wT=params['out_wT'].astype(jnp.bfloat16),
                out_b=params['out_b'],
                out_wT_pad=out_wT_pad.astype(jnp.bfloat16),
                out_b_pad=out_b_pad)


# ---------------------------------------------------------------------------
if __name__ == "__main__":
    # in_dim == out_dim == 64 (forward feeds embedding output into in_layer),
    # hidden=32, batch=16 split into 2 parallel groups, 16 generation steps.
    B, H, V, INIT, STEPS, GROUPS = 16, 32, 64, 32, 16, 2
    key = jax.random.PRNGKey(0)
    kp, ki = jax.random.split(key)
    params = init_params(kp, in_dim=V, hidden_dim=H, out_dim=V, init_dim=INIT)
    kparams = prepare_kernel_params(params)

    # init_to_hidden glue (matches module.init_to_hidden): tanh(init @ W^T + b)
    init = jax.random.normal(ki, (B, INIT), jnp.float32)
    h0 = jnp.tanh(init @ params['init_wT'] + params['init_b'])      # (B, H)
    hidden = (h0[None], h0[None])                                   # (1, B, H) each
    event = jnp.full((1, B), V - 1, dtype=jnp.int32)                # primary event

    # reference: same math as the PyTorch module, emulating the kernels'
    # bf16 matmul operands / f32 accumulation, with an exact tanh g-gate.
    w_xhT_ref = jnp.concatenate([params['w_ihT'], params['w_hhT']], 0).astype(jnp.bfloat16)

    def ref_step(ev, h, c):
        onehot = jax.nn.one_hot(ev, V, dtype=jnp.bfloat16)
        x = jnp.dot(onehot, kparams['fused_w'],
                    preferred_element_type=jnp.float32) + params['in_b']
        x = jnp.maximum(x, 0.1 * x)
        xh = jnp.concatenate([x, h], axis=1).astype(jnp.bfloat16)
        g = jnp.dot(xh, w_xhT_ref, preferred_element_type=jnp.float32)
        i = jax.nn.sigmoid(g[:, :H]); f = jax.nn.sigmoid(g[:, H:2 * H])
        gg = jnp.tanh(g[:, 2 * H:3 * H]); o = jax.nn.sigmoid(g[:, 3 * H:])
        c_n = f * c + i * gg
        h_n = o * jnp.tanh(c_n)
        out = jnp.dot(h_n.astype(jnp.bfloat16), kparams['out_wT'],
                      preferred_element_type=jnp.float32) + params['out_b']
        return out, h_n, c_n

    # ---------------- single-step forward check ----------------
    logits, (h1, c1) = performance_rnn_forward(event, kparams, hidden)
    jax.block_until_ready((logits, h1, c1))

    r_logits, r_h1, r_c1 = ref_step(event[0], h0, h0)
    assert logits.shape == (1, B, V) and h1.shape == (1, B, H) and c1.shape == (1, B, H)
    assert jnp.allclose(logits[0], r_logits, atol=5e-3, rtol=5e-3)
    assert jnp.allclose(h1[0], r_h1, atol=3e-3, rtol=3e-3)
    assert jnp.allclose(c1[0], r_c1, atol=3e-3, rtol=3e-3)

    # ---------------- fused greedy generate check ----------------
    events, gen_logits = performance_rnn_generate(kparams, h0, h0, STEPS,
                                                  batch_groups=GROUPS)
    jax.block_until_ready((events, gen_logits))
    assert events.shape == (STEPS, B) and gen_logits.shape == (STEPS, B, V)

    # (1) in-kernel greedy choice must equal argmax of the kernel's own logits
    assert jnp.array_equal(events, jnp.argmax(gen_logits, axis=-1).astype(jnp.int32))

    # (2) per-step math vs. the reference, teacher-forced on the kernel events
    ev = jnp.full((B,), V - 1, dtype=jnp.int32)
    h, c = h0, h0
    ref_logits = []
    for t in range(STEPS):
        lg, h, c = ref_step(ev, h, c)
        ref_logits.append(lg)
        ev = events[t]
    ref_logits = jnp.stack(ref_logits, 0)
    assert jnp.allclose(gen_logits, ref_logits, atol=1e-2, rtol=1e-2)

    print("KERNEL_OK")
</pallas_src>

<mosaic_0001>
module attributes {stable_mosaic.version = 11 : i64} {
  func.func @performance_rnn_fwd_kernel(%arg0: memref<16x1xi32, #tpu.memory_space<vmem>>, %arg1: memref<64x32xbf16, #tpu.memory_space<vmem>>, %arg2: memref<1x32xf32, #tpu.memory_space<vmem>>, %arg3: memref<64x128xbf16, #tpu.memory_space<vmem>>, %arg4: memref<32x64xbf16, #tpu.memory_space<vmem>>, %arg5: memref<1x64xf32, #tpu.memory_space<vmem>>, %arg6: memref<16x32xf32, #tpu.memory_space<vmem>>, %arg7: memref<16x32xf32, #tpu.memory_space<vmem>>, %arg8: memref<16x128xf32, #tpu.memory_space<vmem>>) attributes {dimension_semantics = [], scalar_prefetch = 0 : i64, scratch_operands = 0 : i64, tpu.core_type = #tpu.core_type<tc>} {
    %c0 = arith.constant 0 : index
    %c0_0 = arith.constant 0 : index
    %0 = vector.load %arg0[%c0, %c0_0] : memref<16x1xi32, #tpu.memory_space<vmem>>, vector<16x1xi32>
    %1 = tpu.iota {dimensions = array<i32: 1>} : vector<16x64xi32>
    %2 = vector.broadcast %0 : vector<16x1xi32> to vector<16x64xi32>
    %3 = arith.cmpi eq, %2, %1 : vector<16x64xi32>
    %4 = arith.extui %3 : vector<16x64xi1> to vector<16x64xi32>
    %5 = arith.sitofp %4 : vector<16x64xi32> to vector<16x64xf32>
    %6 = arith.truncf %5 : vector<16x64xf32> to vector<16x64xbf16>
    %c0_1 = arith.constant 0 : index
    %c0_2 = arith.constant 0 : index
    %7 = vector.load %arg1[%c0_1, %c0_2] : memref<64x32xbf16, #tpu.memory_space<vmem>>, vector<64x32xbf16>
    %cst = arith.constant dense<0.000000e+00> : vector<16x32xf32>
    %8 = tpu.matmul %6, %7, %cst {dimension_numbers = #tpu.dot_dimension_numbers<[1], [0], [0], [1], [0, 0, 1, 1], [], []>} : vector<16x64xbf16>, vector<64x32xbf16>, vector<16x32xf32> -> vector<16x32xf32>
    %c0_3 = arith.constant 0 : index
    %c0_4 = arith.constant 0 : index
    %9 = vector.load %arg2[%c0_3, %c0_4] : memref<1x32xf32, #tpu.memory_space<vmem>>, vector<1x32xf32>
    %10 = vector.broadcast %9 : vector<1x32xf32> to vector<16x32xf32>
    %11 = arith.addf %8, %10 : vector<16x32xf32>
    %cst_5 = arith.constant 1.000000e-01 : f32
    %12 = vector.broadcast %cst_5 : f32 to vector<16x32xf32>
    %13 = arith.mulf %12, %11 : vector<16x32xf32>
    %14 = arith.maximumf %11, %13 : vector<16x32xf32>
    %c0_6 = arith.constant 0 : index
    %c0_7 = arith.constant 0 : index
    %15 = vector.load %arg6[%c0_6, %c0_7] : memref<16x32xf32, #tpu.memory_space<vmem>>, vector<16x32xf32>
    %16 = tpu.concatenate %14, %15 in 1 : vector<16x32xf32>, vector<16x32xf32> -> vector<16x64xf32>
    %17 = arith.truncf %16 : vector<16x64xf32> to vector<16x64xbf16>
    %c0_8 = arith.constant 0 : index
    %c0_9 = arith.constant 0 : index
    %18 = vector.load %arg3[%c0_8, %c0_9] : memref<64x128xbf16, #tpu.memory_space<vmem>>, vector<64x128xbf16>
    %cst_10 = arith.constant dense<0.000000e+00> : vector<16x128xf32>
    %19 = tpu.matmul %17, %18, %cst_10 {dimension_numbers = #tpu.dot_dimension_numbers<[1], [0], [0], [1], [0, 0, 1, 1], [], []>} : vector<16x64xbf16>, vector<64x128xbf16>, vector<16x128xf32> -> vector<16x128xf32>
    %20 = arith.negf %19 : vector<16x128xf32>
    %21 = math.exp %20 : vector<16x128xf32>
    %cst_11 = arith.constant 1.000000e+00 : f32
    %22 = vector.broadcast %cst_11 : f32 to vector<16x128xf32>
    %23 = arith.addf %22, %21 : vector<16x128xf32>
    %24 = arith.divf %22, %23 : vector<16x128xf32>
    %25 = vector.extract_strided_slice %24 {offsets = [0, 0], sizes = [16, 32], strides = [1, 1]} : vector<16x128xf32> to vector<16x32xf32>
    %26 = vector.extract_strided_slice %24 {offsets = [0, 32], sizes = [16, 32], strides = [1, 1]} : vector<16x128xf32> to vector<16x32xf32>
    %27 = vector.extract_strided_slice %24 {offsets = [0, 64], sizes = [16, 32], strides = [1, 1]} : vector<16x128xf32> to vector<16x32xf32>
    %cst_12 = arith.constant 2.000000e+00 : f32
    %28 = vector.broadcast %cst_12 : f32 to vector<16x32xf32>
    %29 = arith.mulf %28, %27 : vector<16x32xf32>
    %cst_13 = arith.constant 1.000000e+00 : f32
    %30 = vector.broadcast %cst_13 : f32 to vector<16x32xf32>
    %31 = arith.subf %29, %30 : vector<16x32xf32>
    %32 = vector.extract_strided_slice %24 {offsets = [0, 96], sizes = [16, 32], strides = [1, 1]} : vector<16x128xf32> to vector<16x32xf32>
    %c0_14 = arith.constant 0 : index
    %c0_15 = arith.constant 0 : index
    %33 = vector.load %arg7[%c0_14, %c0_15] : memref<16x32xf32, #tpu.memory_space<vmem>>, vector<16x32xf32>
    %34 = arith.mulf %26, %33 : vector<16x32xf32>
    %35 = arith.mulf %25, %31 : vector<16x32xf32>
    %36 = arith.addf %34, %35 : vector<16x32xf32>
    %37 = math.tanh %36 : vector<16x32xf32>
    %38 = arith.mulf %32, %37 : vector<16x32xf32>
    %39 = arith.truncf %38 : vector<16x32xf32> to vector<16x32xbf16>
    %c0_16 = arith.constant 0 : index
    %c0_17 = arith.constant 0 : index
    %40 = vector.load %arg4[%c0_16, %c0_17] : memref<32x64xbf16, #tpu.memory_space<vmem>>, vector<32x64xbf16>
    %cst_18 = arith.constant dense<0.000000e+00> : vector<16x64xf32>
    %41 = tpu.matmul %39, %40, %cst_18 {dimension_numbers = #tpu.dot_dimension_numbers<[1], [0], [0], [1], [0, 0, 1, 1], [], []>} : vector<16x32xbf16>, vector<32x64xbf16>, vector<16x64xf32> -> vector<16x64xf32>
    %c0_19 = arith.constant 0 : index
    %c0_20 = arith.constant 0 : index
    %42 = vector.load %arg5[%c0_19, %c0_20] : memref<1x64xf32, #tpu.memory_space<vmem>>, vector<1x64xf32>
    %43 = vector.broadcast %42 : vector<1x64xf32> to vector<16x64xf32>
    %44 = arith.addf %41, %43 : vector<16x64xf32>
    %45 = tpu.concatenate %44, %38, %36 in 1 : vector<16x64xf32>, vector<16x32xf32>, vector<16x32xf32> -> vector<16x128xf32>
    %c0_21 = arith.constant 0 : index
    %c0_22 = arith.constant 0 : index
    %46 = vector.load %arg8[%c0_21, %c0_22] : memref<16x128xf32, #tpu.memory_space<vmem>>, vector<16x128xf32>
    tpu.vector_store %arg8[%c0_21, %c0_22], %45 {strides = array<i32>} : memref<16x128xf32, #tpu.memory_space<vmem>>, vector<16x128xf32>,
    return
  }
}

</mosaic_0001>

<bundles_post_ra>
// kernel: tpu_custom_call.1
= control target key start
LH: loop header
LB: loop body
LE: loop exit
PB: predicated region body
PF: predicated region fallthrough
CT: control target
= control target key end

     0   :  { %13 = vsyncpa [#allocation3], 0  ;;  %s711_s0 = inlined_call_operand.vmem [shape: s32[16,1], index: 0, kind: input, shape index: {}]   ;;  %s712_s1 = inlined_call_operand.vmem [shape: bf16[64,32], index: 1, kind: input, shape index: {}]   ;;  %s713_s2 = inlined_call_operand.vmem [shape: f32[1,32], index: 2, kind: input, shape index: {}]   ;;  %s714_s3 = inlined_call_operand.vmem [shape: bf16[64,128], index: 3, kind: input, shape index: {}]   ;;  %s715_s4 = inlined_call_operand.vmem [shape: bf16[32,64], index: 4, kind: input, shape index: {}]   ;;  %s716_s5 = inlined_call_operand.vmem [shape: f32[1,64], index: 5, kind: input, shape index: {}]   ;;  %s717_s6 = inlined_call_operand.vmem [shape: f32[16,32], index: 6, kind: input, shape index: {}]   ;;  %s718_s7 = inlined_call_operand.hbm [shape: f32[16,32], index: 7, kind: input, shape index: {}]   ;;  %s719_s8 = inlined_call_operand.hbm [shape: f32[16,128], index: 8, kind: output, shape index: {}]  }
   0x1   :  { %14 = vsyncpa [#allocation4], 0  ;;  %s559_s27 = smov [#allocation2]  }
   0x2   :  { %s34_s28 = sshll.u32 %s559_s27, 4  ;;  %s35_s28 = int_to_ptr.vmem [resolvable:$true] %s34_s28 }
   0x3   :  { %s523_s29 = scalar_lea.vmem %s35_s28, 256  ;;  %p528_p1 = scmp.lt.s32.totalorder %s35_s28, %s35_s28 }
   0x4   :  { %p524_p0 = scmp.ne.s32.totalorder %s35_s28, %s523_s29  ;;  %p529_p2 = scmp.lt.s32.totalorder %s523_s29, %s523_s29 }
   0x6   :  { %p530_p3 = por %p529_p2, %p528_p1 }
   0x8   :  { %p531_p4 = pnand %p530_p3, %p524_p0 }
   0xa   :  { %534 = shalt.err (!%p531_p4)
}
   0xb   :  { %s560_s30 = smov 128   ;;  %s561_s9 = smov 8  }
   0xc   :  { %40 = dma.hbm_to_vmem [thread:$0]  %s718_s7, 256, %s35_s28, [#allocation3], %s560_s30, %s560_s30, %s561_s9  }
   0xd   :  { %555 = dma.done.wait [#allocation3], 256  }
   0xe   :  { %556 = vsyncadd [#allocation3], 4294967040  ;;  %v562_v0 = vmov 0   ;;  %v563_v1 = vmov 0.0   ;;  %v45_v2 = vld [vmem:[%s711_s0] sm:$0xff]  ;;  %v493_v3 = vld [vmem:[%s712_s1 + $0x18] sm:$0xff]   ;;  %v47_v12 = vlaneseq }
   0xf   :  { %487 = vset.pattern.permute.xlu0 %v562_v0  ;;  %445 = vmatprep.subr.bf16.mxu0 %v563_v1  ;;  %v46_v4 = vld [vmem:[%s711_s0 + $0x8] sm:$0xff]  ;;  %v494_v5 = vld [vmem:[%s712_s1 + $0x10] sm:$0xff]   ;;  %vm564_vm0 = vmmov 0   ;;  %v150_v6 = vld [vmem:[%s717_s6] sm:$0xff]  ;;  %s565_s26 = smov 32   ;;  %vm101_vm3 = vcmask 523264  }
  0x10   :  { %457 = vmatprep.subr.bf16.mxu1 %v563_v1  ;;  %50 = vperm.xlu0 %487, %v45_v2   ;;  %v151_v7 = vld [vmem:[%s717_s6 + $0x8] sm:$0xff]  ;;  %v497_v10 = vld [vmem:[%s714_s3 + $0x18] sm:$0xff]   ;;  %v496_v11 = vld [vmem:[%s712_s1] sm:$0xff]   ;;  %v48_v13 = vand.u32 127, %v47_v12  ;;  %vm160_vm4 = vcmask 261120   ;;  %s567_s17 = smov 96  }
  0x11   :  { %446 = vmatpush3.bf16.msra.mxu0 %v493_v3  ;;  %453 = vmatprep.mubr.msk.bf16.mxu0 %vm564_vm0, %v563_v1  ;;  %v495_v8 = vld [vmem:[%s712_s1 + $0x8] sm:$0xff]   ;;  %v488_v9 = vpack.i.bf16 %v151_v7, %v150_v6  ;;  %v498_v19 = vld [vmem:[%s714_s3 + $0x10] sm:$0xff]   ;;  %v500_v21 = vld [vmem:[%s714_s3] sm:$0xff]   ;;  %vm389_vm5 = vcmask 785408   ;;  %s568_s19 = smov [#allocation5]  }
  0x12   :  { %447 = vmatprep.subr.bf16.mxu0 %v563_v1  ;;  %465 = vmatprep.mubr.msk.bf16.mxu1 %vm564_vm0, %v563_v1  ;;  %v499_v20 = vld [vmem:[%s714_s3 + $0x8] sm:$0xff]   ;;  %v413_v22 = vld [vmem:[%s713_s2] ss:$0 sm:$0xff]  ;;  %s566_s2 = smov 64   ;;  %s399_s20 = sshll.u32 %s568_s19, 4  ;;  %s400_s20 = int_to_ptr.vmem [resolvable:$true] %s399_s20 }
  0x13   :  { %489 = vrot.lane.b32.xlu1 %v488_v9, %s565_s26  ;;  %458 = vmatpush3.bf16.msra.mxu1 %v497_v10  ;;  %v256_v54 = vld [vmem:[#allocation2] sm:$0xff]  ;;  %v257_v56 = vld [vmem:[#allocation2 + $0x8] sm:$0xff]  ;;  %p540_p6 = scmp.lt.s32.totalorder %s400_s20, %s400_s20 }
  0x14   :  { %53 = vperm.xlu0 %487, %v46_v4   ;;  %459 = vmatprep.subr.bf16.mxu1 %v563_v1  ;;  %v502_v9 = vld [vmem:[%s715_s4] sm:$0xff]  }
  0x15   :  { %448 = vmatpush3.bf16.msra.mxu0 %v494_v5 }
  0x16   :  { %449 = vmatprep.subr.bf16.mxu0 %v563_v1 }
  0x17   :  { %460 = vmatpush3.bf16.msra.mxu1 %v498_v19 }
  0x18   :  { %461 = vmatprep.subr.bf16.mxu1 %v563_v1 }
  0x19   :  { %450 = vmatpush3.bf16.msra.mxu0 %v495_v8  ;;  %v501_v8 = vld [vmem:[%s715_s4 + $0x8] sm:$0xff]  }
  0x1a   :  { %451 = vmatprep.subr.bf16.mxu0 %v563_v1 }
  0x1b   :  { %462 = vmatpush3.bf16.msra.mxu1 %v499_v20 }
  0x1c   :  { %463 = vmatprep.subr.bf16.mxu1 %v563_v1 }
  0x1d   :  { %452 = vmatpush3.bf16.msra.mxu0 %v496_v11 }
  0x1e   :  { %469 = vmatprep.subr.bf16.mxu0 %v563_v1 }
  0x1f   :  { %464 = vmatpush3.bf16.msra.mxu1 %v500_v21 }
  0x85   :  { %v490_v27 = vpop.permute.xlu1 %489 }
  0x86   :  { %v492_v32 = vunpack.i.h.bf16 %v490_v27  ;;  %v491_v33 = vunpack.i.l.bf16 %v490_v27 }
  0x8b   :  { %v51_v14 = vpop.permute.xlu0 %50 }
  0x8c   :  { %vm55_vm1 = vcmp.eq.s32.totalorder %v51_v14, %v48_v13 }
  0x8d   :  { %v411_v16 = vsel %vm55_vm1, 1.0, %v563_v1 }
  0x8f   :  { %v54_v15 = vpop.permute.xlu0 %53 }
  0x90   :  { %vm56_vm2 = vcmp.eq.s32.totalorder %v54_v15, %v48_v13 }
  0x91   :  { %v412_v17 = vsel %vm56_vm2, 1.0, %v563_v1 }
  0x92   :  { %v61_v18 = vpack.c.bf16 %v412_v17, %v411_v16  ;;  %v428_v16 = vld [vmem:[%s716_s5] ss:$0 sm:$0xff]  ;;  %s535_s5 = scalar_lea.vmem %s400_s20, 256 }
  0x93   :  { %p536_p5 = scmp.ne.s32.totalorder %s400_s20, %s535_s5  ;;  %p541_p7 = scmp.lt.s32.totalorder %s535_s5, %s535_s5 }
  0x94   :  { %454 = vmatmul.mubr.msk.bf16.vlgmr.msra.gmra.mxu0 %vm101_vm3, %v61_v18 }
  0x95   :  { %473 = vmatprep.mubr.msk.bf16.mxu0 %vm564_vm0, %v563_v1  ;;  %470 = vmatpush3.bf16.msra.mxu0 %v501_v8  ;;  %p542_p8 = por %p541_p7, %p540_p6 }
  0x96   :  { %471 = vmatprep.subr.bf16.mxu0 %v563_v1 }
  0x97   :  { %p543_p9 = pnand %p542_p8, %p536_p5 }
  0x99   :  { %472 = vmatpush3.bf16.msra.mxu0 %v502_v9 }
 0x154   :  { %v139_v23 = vpop.f32.mrf.mxu0 }
 0x155   :  { %v140_v24 = vadd.f32 %v413_v22, %v139_v23 }
 0x156   :  { %v455_v25 = vpop.f32.mrf.mxu0 }
 0x157   :  { %v146_v26 = vmul.f32 0.1, %v140_v24 }
 0x158   :  { %v142_v28 = vpop.f32.mrf.mxu0 }
 0x159   :  { %v143_v29 = vadd.f32 %v413_v22, %v142_v28  ;;  %v148_v31 = vmax.f32 %v140_v24, %v146_v26 }
 0x15a   :  { %v456_v30 = vpop.f32.mrf.mxu0 }
 0x15b   :  { %v147_v34 = vmul.f32 0.1, %v143_v29  ;;  %v161_v36 = vsel %vm160_vm4, %v148_v31, %v491_v33 }
 0x15d   :  { %v149_v35 = vmax.f32 %v143_v29, %v147_v34 }
 0x15f   :  { %v162_v37 = vsel %vm160_vm4, %v149_v35, %v492_v32 }
 0x160   :  { %v163_v38 = vpack.c.bf16 %v162_v37, %v161_v36 }
 0x162   :  { %466 = vmatmul.mubr.msk.bf16.vlgmr.msra.gmra.mxu1 %vm101_vm3, %v163_v38 }
 0x222   :  { %v233_v39 = vpop.f32.mrf.mxu1 }
 0x223   :  { %v424_v40 = vmul.f32 -1.442695, %v233_v39 }
 0x224   :  { %v467_v41 = vpop.f32.mrf.mxu1 }
 0x225   :  { %503 = vpow2.f32 %v424_v40 }
 0x226   :  { %v236_v42 = vpop.f32.mrf.mxu1 }
 0x227   :  { %v425_v43 = vmul.f32 -1.442695, %v236_v42 }
 0x228   :  { %v468_v44 = vpop.f32.mrf.mxu1 }
 0x229   :  { %505 = vpow2.f32 %v425_v43 }
 0x232   :  { %v504_v45 = vpop.eup %503 }
 0x233   :  { %v246_v46 = vadd.f32 1.0, %v504_v45 }
 0x235   :  { %507 = vrcp.f32 %v246_v46 }
 0x236   :  { %v506_v47 = vpop.eup %505 }
 0x237   :  { %v247_v48 = vadd.f32 1.0, %v506_v47 }
 0x239   :  { %509 = vrcp.f32 %v247_v48 }
 0x242   :  { %v508_v49 = vpop.eup %507 }
 0x243   :  { %v252_v50 = vmul.f32 2.0, %v508_v49 }
 0x245   :  { %v426_v51 = vadd.f32 -1.0, %v252_v50 }
 0x246   :  { %v510_v52 = vpop.eup %509 }
 0x247   :  { %270 = vrot.lane.b32.xlu1 %v426_v51, %s566_s2  ;;  %v253_v53 = vmul.f32 2.0, %v510_v52 }
 0x249   :  { %v427_v55 = vadd.f32 -1.0, %v253_v53 }
 0x24b   :  { %260 = vrot.lane.b32.xlu1 %v256_v54, %s565_s26  ;;  %272 = vrot.lane.b32.xlu0 %v427_v55, %s566_s2 }
 0x24f   :  { %262 = vrot.lane.b32.xlu0 %v257_v56, %s565_s26 }
 0x2b9   :  { %v271_v57 = vpop.permute.xlu1 %270 }
 0x2ba   :  { %v276_v58 = vmul.f32 %v508_v49, %v271_v57 }
 0x2bc   :  { %280 = vrot.lane.b32.xlu1 %v276_v58, %s565_s26 }
 0x2bd   :  { %v273_v59 = vpop.permute.xlu0 %272  ;;  %v261_v61 = vpop.permute.xlu1 %260 }
 0x2be   :  { %v277_v60 = vmul.f32 %v510_v52, %v273_v59  ;;  %v266_v62 = vmul.f32 %v508_v49, %v261_v61 }
 0x2c0   :  { %282 = vrot.lane.b32.xlu0 %v277_v60, %s565_s26 }
 0x2c1   :  { %v263_v63 = vpop.permute.xlu0 %262 }
 0x2c2   :  { %v267_v3 = vmul.f32 %v510_v52, %v263_v63 }
 0x32e   :  { %v281_v0 = vpop.permute.xlu1 %280 }
 0x32f   :  { %v286_v2 = vadd.f32 %v281_v0, %v266_v62 }
 0x331   :  { %511 = vtanh.f32 %v286_v2 }
 0x332   :  { %v283_v4 = vpop.permute.xlu0 %282 }
 0x333   :  { %v287_v5 = vadd.f32 %v283_v4, %v267_v3 }
 0x335   :  { %513 = vtanh.f32 %v287_v5 }
 0x33e   :  { %v512_v6 = vpop.eup %511 }
 0x33f   :  { %292 = vrot.lane.b32.xlu1 %v512_v6, %s566_s2 }
 0x342   :  { %v514_v7 = vpop.eup %513 }
 0x343   :  { %294 = vrot.lane.b32.xlu0 %v514_v7, %s566_s2 }
 0x3b1   :  { %v293_v10 = vpop.permute.xlu1 %292 }
 0x3b2   :  { %v298_v11 = vmul.f32 %v508_v49, %v293_v10 }
 0x3b4   :  { %373 = vrot.lane.b32.xlu0 %v298_v11, %s567_s17 }
 0x3b5   :  { %v295_v12 = vpop.permute.xlu0 %294 }
 0x3b6   :  { %v299_v13 = vmul.f32 %v510_v52, %v295_v12 }
 0x3b8   :  { %v300_v14 = vpack.c.bf16 %v299_v13, %v298_v11  ;;  %381 = vrot.lane.b32.xlu0 %v286_v2, %s566_s2 }
 0x3ba   :  { %313 = vrot.lane.b32.xlu1 %v300_v14, %s565_s26 }
 0x3be   :  { %375 = vrot.lane.b32.xlu1 %v299_v13, %s567_s17 }
 0x3c2   :  { %383 = vrot.lane.b32.xlu1 %v287_v5, %s566_s2 }
 0x426   :  { %v374_v15 = vpop.permute.xlu0 %373 }
 0x42a   :  { %v382_v21 = vpop.permute.xlu0 %381 }
 0x42c   :  { %v314_v1 = vpop.permute.xlu1 %313 }
 0x42d   :  { %474 = vmatmul.mubr.msk.bf16.vlgmr.msra.gmra.mxu0 %vm160_vm4, %v314_v1 }
 0x430   :  { %v376_v18 = vpop.permute.xlu1 %375 }
 0x434   :  { %v384_v27 = vpop.permute.xlu1 %383 }
 0x4ed   :  { %v364_v17 = vpop.f32.mrf.mxu0 }
 0x4ee   :  { %v365_v19 = vadd.f32 %v428_v16, %v364_v17 }
 0x4ef   :  { %v475_v20 = vpop.f32.mrf.mxu0 }
 0x4f0   :  { %v387_v22 = vsel %vm101_vm3, %v365_v19, %v374_v15 }
 0x4f1   :  { %v367_v23 = vpop.f32.mrf.mxu0  ;;  %v390_v24 = vsel %vm389_vm5, %v387_v22, %v382_v21 }
 0x4f2   :  { %v368_v25 = vadd.f32 %v428_v16, %v367_v23  ;;  %392 = vst [vmem:[#allocation5] sm:$0xff] %v390_v24 }
 0x4f3   :  { %v476_v26 = vpop.f32.mrf.mxu0 }
 0x4f4   :  { %v388_v28 = vsel %vm101_vm3, %v368_v25, %v376_v18 }
 0x4f5   :  { %v391_v29 = vsel %vm389_vm5, %v388_v28, %v384_v27 }
 0x4f6   :  { %393 = vst [vmem:[#allocation5 + $0x8] sm:$0xff] %v391_v29 }
 0x4f7   :  { %546 = shalt.err (!%p543_p9)
}
 0x4f8   :  { %405 = dma.vmem_to_hbm [thread:$0]  %s400_s20, 256, %s719_s8, [#allocation4], %s560_s30, %s560_s30, %s561_s9  }
 0x4f9   :  { %557 = dma.done.wait [#allocation4], 256  }
 0x4fa   :  { %558 = vsyncadd [#allocation4], 4294967040 }
 0x4fb   :  { %409 = vsyncpa [#allocation3], 1 }
 0x4fc   :  { %410 = vsyncpa [#allocation4], 1 }

</bundles_post_ra>
